<compile_context>
chip_gen: v6e
topology: v6e:2x2x1
jax: 0.10.0
libtpu: 0.0.40
codegen_flags: <defaults>
</compile_context>

<pallas_src>
import math
import functools

import jax
import jax.numpy as jnp
from jax.experimental import pallas as pl
from jax.experimental.pallas import tpu as pltpu


def _attention_kernel(x_ref, wq_ref, wk_ref, wv_ref, wo_ref, o_ref, acc_ref,
                      *, scale, use_cosine):
    """One (batch, head) grid step.

    x_ref  : (T, D)  bf16   input block (batch dim squeezed)
    wq/wk/wv_ref : (D, hd) bf16  per-head, pre-transposed projection weights
    wo_ref : (hd, D) bf16   per-head slice of out_proj^T
    o_ref  : (T, D)  output block (written only on the last head)
    acc_ref: (T, D)  f32 VMEM accumulator for the output projection
    """
    h = pl.program_id(1)

    @pl.when(h == 0)
    def _():
        acc_ref[...] = jnp.zeros_like(acc_ref)

    x = x_ref[...]                                                    # (T, D) bf16

    # Per-head q/k/v projections: x @ W_h  (MXU, bf16 in / f32 accumulate).
    qh = jnp.dot(x, wq_ref[...], preferred_element_type=jnp.float32)  # (T, hd)
    kh = jnp.dot(x, wk_ref[...], preferred_element_type=jnp.float32)  # (T, hd)
    vh = jnp.dot(x, wv_ref[...], preferred_element_type=jnp.float32)  # (T, hd)

    if use_cosine:
        # TODO(synk): exact eps/scaling of the repo's `normalize()` is unknown;
        # using plain L2 normalization over head_dim (cosine attention).
        eps = 1e-12
        qh = qh * jax.lax.rsqrt(jnp.sum(qh * qh, axis=-1, keepdims=True) + eps)
        kh = kh * jax.lax.rsqrt(jnp.sum(kh * kh, axis=-1, keepdims=True) + eps)

    # Fold the softmax scale into q (T*hd multiplies instead of T*T).
    qh = qh * scale

    # s = q @ k^T without an in-kernel transpose (contract dim 1 of both).
    s = jnp.einsum("qd,kd->qk", qh.astype(jnp.bfloat16), kh.astype(jnp.bfloat16),
                   preferred_element_type=jnp.float32)                # (T, T) f32

    m = jnp.max(s, axis=-1, keepdims=True)
    p = jnp.exp(s - m)                                                # unnormalized
    row_sum = jnp.sum(p, axis=-1, keepdims=True)                      # (T, 1)

    oh = jnp.dot(p.astype(jnp.bfloat16), vh.astype(jnp.bfloat16),
                 preferred_element_type=jnp.float32)                  # (T, hd)
    # Normalize after the PV matmul on the small (T, hd) tile; EUP reciprocal.
    oh = oh * pl.reciprocal(row_sum, approx=True)

    # Per-head contribution to the output projection, accumulated lane-dense.
    acc_ref[...] += jnp.dot(oh.astype(jnp.bfloat16), wo_ref[...],
                            preferred_element_type=jnp.float32)       # (T, D)

    @pl.when(h == pl.num_programs(1) - 1)
    def _():
        o_ref[...] = acc_ref[...].astype(o_ref.dtype)


def _mp_weight(w, use_wn):
    """MPLinear effective weight: optional per-output-row L2 normalization,
    then magnitude-preserving 1/sqrt(fan_in) scaling."""
    in_dim = w.shape[1]
    if use_wn:
        w = w / (jnp.linalg.norm(w, axis=1, keepdims=True) + 1e-12)
    return w / jnp.sqrt(jnp.float32(in_dim))


def attention_forward(x, params, *, num_heads, use_cosine, use_wn=True):
    """x: (B, T, D) float32. params: dict of raw (D, D) weights (out x in)."""
    B, T, D = x.shape
    assert D % num_heads == 0
    H = num_heads
    hd = D // num_heads
    scale = 1.0 / math.sqrt(hd)

    wq = _mp_weight(params["wq"], use_wn)
    wk = _mp_weight(params["wk"], use_wn)
    wv = _mp_weight(params["wv"], use_wn)
    wo = _mp_weight(params["wo"], use_wn)

    # Head-major, pre-transposed weight layout (wrapper-side layout plumbing):
    #   wq_heads[h] = wq[h*hd:(h+1)*hd, :].T  -> (H, D, hd)   so qh = x @ wq_heads[h]
    def to_heads_T(w):
        return jnp.asarray(w.reshape(H, hd, D).transpose(0, 2, 1), dtype=jnp.bfloat16)

    wq_h = to_heads_T(wq)
    wk_h = to_heads_T(wk)
    wv_h = to_heads_T(wv)
    #   woT_heads[h] = wo^T[h*hd:(h+1)*hd, :] -> (H, hd, D)   so out += oh @ woT_heads[h]
    wo_h = jnp.asarray(wo.T.reshape(H, hd, D), dtype=jnp.bfloat16)

    x_bf = x.astype(jnp.bfloat16)

    kernel = functools.partial(_attention_kernel, scale=scale, use_cosine=use_cosine)

    # Explicit scoped-VMEM budget from the actual block footprint (with headroom),
    # capped below v7x's 64 MiB physical VMEM.
    bf, f32 = 2, 4
    est = (2 * T * D * bf                     # x block (double buffered)
           + 2 * 3 * D * hd * bf              # per-head q/k/v weights
           + 2 * hd * D * bf                  # per-head out-proj slab
           + 2 * T * D * f32                  # output block
           + T * D * f32                      # accumulator scratch
           + T * T * f32 + 4 * T * hd * f32)  # in-kernel intermediates
    vmem_limit = int(min(max(2 * est + (8 << 20), 16 << 20), 48 << 20))

    return pl.pallas_call(
        kernel,
        out_shape=jax.ShapeDtypeStruct((B, T, D), x.dtype),
        grid_spec=pltpu.PrefetchScalarGridSpec(
            num_scalar_prefetch=0,
            grid=(B, H),                       # heads last = reduction axis
            in_specs=[
                pl.BlockSpec((pl.Squeezed(), T, D), lambda b, h: (b, 0, 0)),   # x
                pl.BlockSpec((pl.Squeezed(), D, hd), lambda b, h: (h, 0, 0)),  # wq_h
                pl.BlockSpec((pl.Squeezed(), D, hd), lambda b, h: (h, 0, 0)),  # wk_h
                pl.BlockSpec((pl.Squeezed(), D, hd), lambda b, h: (h, 0, 0)),  # wv_h
                pl.BlockSpec((pl.Squeezed(), hd, D), lambda b, h: (h, 0, 0)),  # woT_h
            ],
            out_specs=pl.BlockSpec((pl.Squeezed(), T, D), lambda b, h: (b, 0, 0)),
            scratch_shapes=[pltpu.VMEM((T, D), jnp.float32)],
        ),
        compiler_params=pltpu.CompilerParams(
            dimension_semantics=("parallel", "arbitrary"),
            vmem_limit_bytes=vmem_limit,
        ),
    )(x_bf, wq_h, wk_h, wv_h, wo_h)


def attention_reference(x, params, *, num_heads, use_cosine, use_wn=True):
    """Pure-JAX (f32) reference mirroring the PyTorch forward."""
    B, T, D = x.shape
    hd = D // num_heads
    scale = 1.0 / math.sqrt(hd)

    wq = _mp_weight(params["wq"], use_wn)
    wk = _mp_weight(params["wk"], use_wn)
    wv = _mp_weight(params["wv"], use_wn)
    wo = _mp_weight(params["wo"], use_wn)

    q = x @ wq.T
    k = x @ wk.T
    v = x @ wv.T

    def split(t):  # (B, T, D) -> (B, H, T, hd)
        return t.reshape(B, T, num_heads, hd).transpose(0, 2, 1, 3)

    q, k, v = split(q), split(k), split(v)
    if use_cosine:
        q = q / jnp.sqrt(jnp.sum(q * q, axis=-1, keepdims=True) + 1e-12)
        k = k / jnp.sqrt(jnp.sum(k * k, axis=-1, keepdims=True) + 1e-12)

    s = jnp.einsum("bhqd,bhkd->bhqk", q, k) * scale
    p = jax.nn.softmax(s, axis=-1)
    o = jnp.einsum("bhqk,bhkd->bhqd", p, v)
    o = o.transpose(0, 2, 1, 3).reshape(B, T, D)
    return o @ wo.T


if __name__ == "__main__":
    B, T, D = 2, 8, 32
    NUM_HEADS = 4
    USE_COSINE = True

    key = jax.random.PRNGKey(0)
    kx, kq, kk, kv, ko = jax.random.split(key, 5)
    x = jax.random.normal(kx, (B, T, D), dtype=jnp.float32)
    params = {
        "wq": jax.random.normal(kq, (D, D), dtype=jnp.float32),
        "wk": jax.random.normal(kk, (D, D), dtype=jnp.float32),
        "wv": jax.random.normal(kv, (D, D), dtype=jnp.float32),
        "wo": jax.random.normal(ko, (D, D), dtype=jnp.float32),
    }

    out = attention_forward(x, params, num_heads=NUM_HEADS, use_cosine=USE_COSINE)
    out = jax.block_until_ready(out)

    ref = attention_reference(x, params, num_heads=NUM_HEADS, use_cosine=USE_COSINE)
    assert out.shape == (B, T, D)
    # bf16 MXU operands + approx reciprocal -> compare with a bf16-scale tolerance.
    max_err = float(jnp.abs(out - ref).max())
    assert jnp.allclose(out, ref, atol=5e-2, rtol=5e-2), max_err

    print("KERNEL_OK")
</pallas_src>

<mosaic_0001>
module attributes {stable_mosaic.version = 11 : i64} {
  func.func @_attention_kernel(%arg0: i32, %arg1: i32, %arg2: memref<1x8x32xbf16, #tpu.memory_space<vmem>>, %arg3: memref<1x32x8xbf16, #tpu.memory_space<vmem>>, %arg4: memref<1x32x8xbf16, #tpu.memory_space<vmem>>, %arg5: memref<1x32x8xbf16, #tpu.memory_space<vmem>>, %arg6: memref<1x8x32xbf16, #tpu.memory_space<vmem>>, %arg7: memref<1x8x32xf32, #tpu.memory_space<vmem>>, %arg8: memref<8x32xf32, #tpu.memory_space<vmem>>) attributes {dimension_semantics = [#tpu.dimension_semantics<parallel>, #tpu.dimension_semantics<arbitrary>], iteration_bounds = array<i64: 2, 4>, scalar_prefetch = 0 : i64, scratch_operands = 1 : i64, tpu.core_type = #tpu.core_type<tc>, window_params = [{transform_indices = @transform_0, window_bounds = array<i64: 1, 8, 32>}, {transform_indices = @transform_1, window_bounds = array<i64: 1, 32, 8>}, {transform_indices = @transform_2, window_bounds = array<i64: 1, 32, 8>}, {transform_indices = @transform_3, window_bounds = array<i64: 1, 32, 8>}, {transform_indices = @transform_4, window_bounds = array<i64: 1, 8, 32>}, {transform_indices = @transform_5, window_bounds = array<i64: 1, 8, 32>}]} {
    %c0_i32 = arith.constant 0 : i32
    %0 = arith.cmpi eq, %arg1, %c0_i32 : i32
    %1 = arith.extui %0 : i1 to i32
    %c0_i32_0 = arith.constant 0 : i32
    %2 = arith.cmpi ne, %1, %c0_i32_0 : i32
    scf.if %2 {
      %cst_32 = arith.constant 0.000000e+00 : f32
      %58 = vector.broadcast %cst_32 : f32 to vector<8x32xf32>
      %c0_33 = arith.constant 0 : index
      %c0_34 = arith.constant 0 : index
      %59 = vector.load %arg8[%c0_33, %c0_34] : memref<8x32xf32, #tpu.memory_space<vmem>>, vector<8x32xf32>
      tpu.vector_store %arg8[%c0_33, %c0_34], %58 {strides = array<i32>} : memref<8x32xf32, #tpu.memory_space<vmem>>, vector<8x32xf32>,
    } else {
    }
    %c0 = arith.constant 0 : index
    %c0_1 = arith.constant 0 : index
    %c0_2 = arith.constant 0 : index
    %3 = vector.load %arg2[%c0, %c0_1, %c0_2] : memref<1x8x32xbf16, #tpu.memory_space<vmem>>, vector<1x8x32xbf16>
    %4 = vector.shape_cast %3 : vector<1x8x32xbf16> to vector<8x32xbf16>
    %c0_3 = arith.constant 0 : index
    %c0_4 = arith.constant 0 : index
    %c0_5 = arith.constant 0 : index
    %5 = vector.load %arg3[%c0_3, %c0_4, %c0_5] : memref<1x32x8xbf16, #tpu.memory_space<vmem>>, vector<1x32x8xbf16>
    %6 = vector.shape_cast %5 : vector<1x32x8xbf16> to vector<32x8xbf16>
    %cst = arith.constant dense<0.000000e+00> : vector<8x8xf32>
    %7 = tpu.matmul %4, %6, %cst {dimension_numbers = #tpu.dot_dimension_numbers<[1], [0], [0], [1], [0, 0, 1, 1], [], []>} : vector<8x32xbf16>, vector<32x8xbf16>, vector<8x8xf32> -> vector<8x8xf32>
    %c0_6 = arith.constant 0 : index
    %c0_7 = arith.constant 0 : index
    %c0_8 = arith.constant 0 : index
    %8 = vector.load %arg4[%c0_6, %c0_7, %c0_8] : memref<1x32x8xbf16, #tpu.memory_space<vmem>>, vector<1x32x8xbf16>
    %9 = vector.shape_cast %8 : vector<1x32x8xbf16> to vector<32x8xbf16>
    %cst_9 = arith.constant dense<0.000000e+00> : vector<8x8xf32>
    %10 = tpu.matmul %4, %9, %cst_9 {dimension_numbers = #tpu.dot_dimension_numbers<[1], [0], [0], [1], [0, 0, 1, 1], [], []>} : vector<8x32xbf16>, vector<32x8xbf16>, vector<8x8xf32> -> vector<8x8xf32>
    %c0_10 = arith.constant 0 : index
    %c0_11 = arith.constant 0 : index
    %c0_12 = arith.constant 0 : index
    %11 = vector.load %arg5[%c0_10, %c0_11, %c0_12] : memref<1x32x8xbf16, #tpu.memory_space<vmem>>, vector<1x32x8xbf16>
    %12 = vector.shape_cast %11 : vector<1x32x8xbf16> to vector<32x8xbf16>
    %cst_13 = arith.constant dense<0.000000e+00> : vector<8x8xf32>
    %13 = tpu.matmul %4, %12, %cst_13 {dimension_numbers = #tpu.dot_dimension_numbers<[1], [0], [0], [1], [0, 0, 1, 1], [], []>} : vector<8x32xbf16>, vector<32x8xbf16>, vector<8x8xf32> -> vector<8x8xf32>
    %14 = arith.mulf %7, %7 : vector<8x8xf32>
    %cst_14 = arith.constant dense<0.000000e+00> : vector<8xf32>
    %15 = vector.multi_reduction <add>, %14, %cst_14 [1] : vector<8x8xf32> to vector<8xf32>
    %16 = vector.shape_cast %15 : vector<8xf32> to vector<8x1xf32>
    %cst_15 = arith.constant 9.99999996E-13 : f32
    %17 = vector.broadcast %cst_15 : f32 to vector<8x1xf32>
    %18 = arith.addf %16, %17 : vector<8x1xf32>
    %19 = math.rsqrt %18 : vector<8x1xf32>
    %20 = vector.broadcast %19 : vector<8x1xf32> to vector<8x8xf32>
    %21 = arith.mulf %7, %20 : vector<8x8xf32>
    %22 = arith.mulf %10, %10 : vector<8x8xf32>
    %cst_16 = arith.constant dense<0.000000e+00> : vector<8xf32>
    %23 = vector.multi_reduction <add>, %22, %cst_16 [1] : vector<8x8xf32> to vector<8xf32>
    %24 = vector.shape_cast %23 : vector<8xf32> to vector<8x1xf32>
    %cst_17 = arith.constant 9.99999996E-13 : f32
    %25 = vector.broadcast %cst_17 : f32 to vector<8x1xf32>
    %26 = arith.addf %24, %25 : vector<8x1xf32>
    %27 = math.rsqrt %26 : vector<8x1xf32>
    %28 = vector.broadcast %27 : vector<8x1xf32> to vector<8x8xf32>
    %29 = arith.mulf %10, %28 : vector<8x8xf32>
    %cst_18 = arith.constant 0.353553385 : f32
    %30 = vector.broadcast %cst_18 : f32 to vector<8x8xf32>
    %31 = arith.mulf %21, %30 : vector<8x8xf32>
    %32 = arith.truncf %31 : vector<8x8xf32> to vector<8x8xbf16>
    %33 = arith.truncf %29 : vector<8x8xf32> to vector<8x8xbf16>
    "tpu.trace_start"() <{level = 10 : i32, message = "qd,kd->qk"}> : () -> ()
    %cst_19 = arith.constant dense<0.000000e+00> : vector<8x8xf32>
    %34 = tpu.matmul %32, %33, %cst_19 {dimension_numbers = #tpu.dot_dimension_numbers<[1], [1], [0], [0], [0, 0, 1, 0], [], []>} : vector<8x8xbf16>, vector<8x8xbf16>, vector<8x8xf32> -> vector<8x8xf32>
    "tpu.trace_stop"() : () -> ()
    %cst_20 = arith.constant dense<0xFF800000> : vector<8xf32>
    %35 = vector.multi_reduction <maximumf>, %34, %cst_20 [1] : vector<8x8xf32> to vector<8xf32>
    %36 = vector.shape_cast %35 : vector<8xf32> to vector<8x1xf32>
    %37 = vector.broadcast %36 : vector<8x1xf32> to vector<8x8xf32>
    %38 = arith.subf %34, %37 : vector<8x8xf32>
    %39 = math.exp %38 : vector<8x8xf32>
    %cst_21 = arith.constant dense<0.000000e+00> : vector<8xf32>
    %40 = vector.multi_reduction <add>, %39, %cst_21 [1] : vector<8x8xf32> to vector<8xf32>
    %41 = vector.shape_cast %40 : vector<8xf32> to vector<8x1xf32>
    %42 = arith.truncf %39 : vector<8x8xf32> to vector<8x8xbf16>
    %43 = arith.truncf %13 : vector<8x8xf32> to vector<8x8xbf16>
    %cst_22 = arith.constant dense<0.000000e+00> : vector<8x8xf32>
    %44 = tpu.matmul %42, %43, %cst_22 {dimension_numbers = #tpu.dot_dimension_numbers<[1], [0], [0], [1], [0, 0, 1, 1], [], []>} : vector<8x8xbf16>, vector<8x8xbf16>, vector<8x8xf32> -> vector<8x8xf32>
    %45 = tpu.reciprocal %41 {approx = true} : vector<8x1xf32> -> vector<8x1xf32>
    %46 = vector.broadcast %45 : vector<8x1xf32> to vector<8x8xf32>
    %47 = arith.mulf %44, %46 : vector<8x8xf32>
    %c0_23 = arith.constant 0 : index
    %c0_24 = arith.constant 0 : index
    %48 = vector.load %arg8[%c0_23, %c0_24] : memref<8x32xf32, #tpu.memory_space<vmem>>, vector<8x32xf32>
    %49 = arith.truncf %47 : vector<8x8xf32> to vector<8x8xbf16>
    %c0_25 = arith.constant 0 : index
    %c0_26 = arith.constant 0 : index
    %c0_27 = arith.constant 0 : index
    %50 = vector.load %arg6[%c0_25, %c0_26, %c0_27] : memref<1x8x32xbf16, #tpu.memory_space<vmem>>, vector<1x8x32xbf16>
    %51 = vector.shape_cast %50 : vector<1x8x32xbf16> to vector<8x32xbf16>
    %cst_28 = arith.constant dense<0.000000e+00> : vector<8x32xf32>
    %52 = tpu.matmul %49, %51, %cst_28 {dimension_numbers = #tpu.dot_dimension_numbers<[1], [0], [0], [1], [0, 0, 1, 1], [], []>} : vector<8x8xbf16>, vector<8x32xbf16>, vector<8x32xf32> -> vector<8x32xf32>
    %53 = arith.addf %48, %52 : vector<8x32xf32>
    %c0_29 = arith.constant 0 : index
    %c0_30 = arith.constant 0 : index
    %54 = vector.load %arg8[%c0_29, %c0_30] : memref<8x32xf32, #tpu.memory_space<vmem>>, vector<8x32xf32>
    tpu.vector_store %arg8[%c0_29, %c0_30], %53 {strides = array<i32>} : memref<8x32xf32, #tpu.memory_space<vmem>>, vector<8x32xf32>,
    %c3_i32 = arith.constant 3 : i32
    %55 = arith.cmpi eq, %arg1, %c3_i32 : i32
    %56 = arith.extui %55 : i1 to i32
    %c0_i32_31 = arith.constant 0 : i32
    %57 = arith.cmpi ne, %56, %c0_i32_31 : i32
    scf.if %57 {
      %c0_32 = arith.constant 0 : index
      %c0_33 = arith.constant 0 : index
      %58 = vector.load %arg8[%c0_32, %c0_33] : memref<8x32xf32, #tpu.memory_space<vmem>>, vector<8x32xf32>
      %c0_34 = arith.constant 0 : index
      %c0_35 = arith.constant 0 : index
      %c0_36 = arith.constant 0 : index
      %59 = vector.load %arg7[%c0_34, %c0_35, %c0_36] : memref<1x8x32xf32, #tpu.memory_space<vmem>>, vector<1x8x32xf32>
      %60 = vector.shape_cast %59 : vector<1x8x32xf32> to vector<8x32xf32>
      %61 = vector.shape_cast %58 : vector<8x32xf32> to vector<1x8x32xf32>
      tpu.vector_store %arg7[%c0_34, %c0_35, %c0_36], %61 {strides = array<i32>} : memref<1x8x32xf32, #tpu.memory_space<vmem>>, vector<1x8x32xf32>,
    } else {
    }
    return
  }
  func.func @transform_0(%arg0: i32, %arg1: i32) -> (i32, i32, i32) {
    %c0_i32 = arith.constant 0 : i32
    %c0_i32_0 = arith.constant 0 : i32
    %c0_i32_1 = arith.constant 0 : i32
    return %arg0, %c0_i32, %c0_i32_0 : i32, i32, i32
  }
  func.func @transform_1(%arg0: i32, %arg1: i32) -> (i32, i32, i32) {
    %c0_i32 = arith.constant 0 : i32
    %c0_i32_0 = arith.constant 0 : i32
    %c0_i32_1 = arith.constant 0 : i32
    return %arg1, %c0_i32, %c0_i32_0 : i32, i32, i32
  }
  func.func @transform_2(%arg0: i32, %arg1: i32) -> (i32, i32, i32) {
    %c0_i32 = arith.constant 0 : i32
    %c0_i32_0 = arith.constant 0 : i32
    %c0_i32_1 = arith.constant 0 : i32
    return %arg1, %c0_i32, %c0_i32_0 : i32, i32, i32
  }
  func.func @transform_3(%arg0: i32, %arg1: i32) -> (i32, i32, i32) {
    %c0_i32 = arith.constant 0 : i32
    %c0_i32_0 = arith.constant 0 : i32
    %c0_i32_1 = arith.constant 0 : i32
    return %arg1, %c0_i32, %c0_i32_0 : i32, i32, i32
  }
  func.func @transform_4(%arg0: i32, %arg1: i32) -> (i32, i32, i32) {
    %c0_i32 = arith.constant 0 : i32
    %c0_i32_0 = arith.constant 0 : i32
    %c0_i32_1 = arith.constant 0 : i32
    return %arg1, %c0_i32, %c0_i32_0 : i32, i32, i32
  }
  func.func @transform_5(%arg0: i32, %arg1: i32) -> (i32, i32, i32) {
    %c0_i32 = arith.constant 0 : i32
    %c0_i32_0 = arith.constant 0 : i32
    %c0_i32_1 = arith.constant 0 : i32
    return %arg0, %c0_i32, %c0_i32_0 : i32, i32, i32
  }
}

</mosaic_0001>

<bundles_post_ra>
// kernel: tpu_custom_call.1
= control target key start
LH: loop header
LB: loop body
LE: loop exit
PB: predicated region body
PF: predicated region fallthrough
CT: control target
= control target key end

     0   :  { %10 = vsyncpa [#allocation4], 0  ;;  %s1299_s0 = inlined_call_operand.vmem [shape: bf16[2,8,32], index: 0, kind: input, shape index: {}]   ;;  %s1300_s1 = inlined_call_operand.vmem [shape: bf16[4,32,8], index: 1, kind: input, shape index: {}]   ;;  %s1301_s2 = inlined_call_operand.vmem [shape: bf16[4,32,8], index: 2, kind: input, shape index: {}]   ;;  %s1302_s3 = inlined_call_operand.vmem [shape: bf16[4,32,8], index: 3, kind: input, shape index: {}]   ;;  %s1303_s4 = inlined_call_operand.vmem [shape: bf16[4,8,32], index: 4, kind: input, shape index: {}]   ;;  %s1304_s5 = inlined_call_operand.hbm [shape: f32[2,8,32], index: 5, kind: output, shape index: {}]  }
   0x1   :  { %12 = vsyncpa [#allocation4 + $0x1], 0  ;;  %s1110_s18 = smov 0   ;;  %s1112_s19 = smov 0  }
   0x2   :  { %s1114_s20 = smov 0   ;;  %s1116_s21 = smov 0  }
   0x3   :  { %s1118_s22 = smov 0   ;;  %s1120_s23 = smov 0  }
   0x4   :  { %s1122_s24 = smov 0   ;;  %s1124_s25 = smov 0  }
   0x5 LB: > { %1311 = sst [smem:[#allocation6_spill]] %s1054_s20  ;;  %s802_s26 = sadd.s32 4294967295, %s1074_s25   ;;  %s1074_s25 = sphi %s1124_s25, %s18_s25   ;;  %s1070_s24 = sphi %s1122_s24, %s1327_s24   ;;  %s1066_s23 = sphi %s1120_s23, %s1326_s23   ;;  %s1062_s22 = sphi %s1118_s22, %s1325_s22   ;;  %s1058_s21 = sphi %s1116_s21, %s1324_s21   ;;  %s1054_s20 = sphi %s1114_s20, %s1323_s20   ;;  %s1050_s19 = sphi %s1112_s19, %s1329_s19   ;;  %s1046_s18 = sphi %s1110_s18, %s1328_s18  }
   0x6   : > { %1312 = sst [smem:[#allocation7_spill]] %s1066_s23  ;;  %s803_s27 = sadd.s32 4294967294, %s1074_s25  }
   0x7   : > { %1313 = sst [smem:[#allocation8_spill]] %s1070_s24  ;;  %s27_s28 = sadd.s32 1, %s1066_s23 }
   0x8   : > { %p28_p0 = scmp.ge.s32.totalorder %s27_s28, 4  ;;  %s30_s29 = sadd.s32 1, %s1070_s24 }
   0x9   : > { %p177_p1 = scmp.ne.s32.totalorder %s1054_s20, %s1050_s19  ;;  %p178_p2 = scmp.eq.s32.totalorder %s802_s26, 7 }
   0xa   : > { %s1331_s28 = smov (%p28_p0, %s27_s28), 0  ;;  %s1333_s29 = smov (!%p28_p0, %s30_s29), %s1070_s24 }
   0xb   : > { %1314 = sst [smem:[#allocation9_spill]] %s1331_s28  ;;  %p1159_p3 = por %p178_p2, %p177_p1 }
   0xc   : > { %p183_p4 = scmp.ne.s32.totalorder %s1050_s19, %s1046_s18  ;;  %p32_p5 = scmp.ge.s32.totalorder %s1333_s29, 2 }
   0xd   : > { %p184_p6 = scmp.eq.s32.totalorder %s803_s27, 7  ;;  %p806_p7 = scmp.ge.s32.totalorder %s1074_s25, 1 }
   0xe   : > { %p240_p8 = scmp.lt.s32.totalorder %s1074_s25, 9  ;;  %s1335_s29 = smov (%p32_p5, %s1333_s29), 0 }
   0xf   : > { %1316 = sst [smem:[#allocation10_spill]] %s1335_s29  ;;  %p1169_p9 = por %p184_p6, %p183_p4 }
  0x10   : > { %p241_p10 = pnand %p806_p7, %p240_p8  ;;  %s164_s7 = ssub.s32 %s1070_s24, %s1335_s29 }
  0x11   : > { %s1317_s6 = scalar_select %p1169_p9, 1, 0 }
  0x12   : > { %s167_s8 = sadd.s32 1, %s1054_s20  ;;  %p165_p11 = scmp.eq.s32.totalorder %s164_s7, 0 }
  0x13   : > { %1318 = sst [smem:[#allocation11_spill]] %s1317_s6  ;;  %244 = sbr.rel (%p241_p10) target bundleno = 1181 (0x49d), region = 40 }
  0x14   : > { %s1177_s9 = scalar_select %p165_p11, %s1054_s20, %s167_s8  }
  0x15   : > { %s1307_s10 = sand.u32 (!%p241_p10), 1, %s1050_s19   ;;  %p286_p12 = scmp.lt.s32.totalorder (!%p241_p10), %s1062_s22, 1 }
  0x16   : > { %1319 = sst [smem:[#allocation12_spill]] %s1177_s9  ;;  %s1183_s11 = sshll.u32 (!%p241_p10), %s1307_s10, 3 }
  0x17   : > { %p290_p13 = scmp.lt.s32.totalorder (!%p241_p10), %s1058_s21, 3  ;;  %p816_p0 = scmp.ne.s32.totalorder (!%p241_p10), %s1058_s21, 0 }
  0x18   : > { %s287_s12 = scalar_select %p286_p12, %s1062_s22, 1 }
  0x19   : > { %s291_s13 = scalar_select %p290_p13, %s1058_s21, 3 }
  0x1a   : > { %s808_s14 = sshll.u32 %s287_s12, 2  ;;  %313 = sbr.rel (%p816_p0) target bundleno = 33 (0x21), region = 44 }
  0x1b   : > { %s289_s17 = scalar_lea.vmem %s1299_s0, %s808_s14  ;;  %s834_s26 = sshll.u32 %s291_s13, 4 }
  0x1c   : > { %s294_s8 = scalar_lea.vmem %s1300_s1, %s834_s26  ;;  %s299_s24 = scalar_lea.vmem %s1301_s2, %s834_s26 }
  0x1d   : > { %s1200_s9 = scalar_lea.vmem %s1302_s3, %s834_s26  ;;  %s815_s20 = sshll.u32 %s291_s13, 2 }
  0x1e   : > { %s1205_s15 = scalar_lea.vmem %s1303_s4, %s815_s20  ;;  %s285_s14 = scalar_lea.vmem [#allocation3], %s1183_s11 }
  0x1f   : > { %vm314_vm0 = vcmask 261120   ;;  %v1076_v0 = vmov 0.0  }
  0x20   : > { %315 = vst.msk [vmem:[#allocation2] sm:$0xff] %vm314_vm0, %v1076_v0 }
  0x21 PF: > { %v968_v1 = vld [vmem:[%s299_s24 + $0x8] sm:$0xff]   ;;  %v1077_v2 = vmov 0.0   ;;  %v970_v4 = vld [vmem:[%s299_s24] sm:$0xff]   ;;  %vm1078_vm1 = vmmov 0   ;;  %vm333_vm2 = vcmask 261120   ;;  %vm490_vm3 = vcmask 64512  }
  0x22   : > { %860 = vmatprep.subr.bf16.mxu1 %v1077_v2  ;;  %852 = vmatprep.subr.bf16.mxu0 %v1077_v2  ;;  %v969_v3 = vld [vmem:[%s294_s8 + $0x8] sm:$0xff]   ;;  %v971_v5 = vld [vmem:[%s294_s8] sm:$0xff]   ;;  %vm567_vm4 = vcmask 1043456   ;;  %p829_p1 = scmp.ne.s32.totalorder %s1058_s21, 3 }
  0x23   : > { %861 = vmatpush3.bf16.msra.mxu1 %v968_v1  ;;  %864 = vmatprep.mubr.msk.bf16.mxu1 %vm1078_vm1, %v1077_v2  ;;  %v316_v6 = vld [vmem:[%s289_s17] sm:$0xf]  ;;  %v972_v19 = vld [vmem:[%s1200_s9 + $0x8] sm:$0xff]  }
  0x24   : > { %853 = vmatpush3.bf16.msra.mxu0 %v969_v3  ;;  %862 = vmatprep.subr.bf16.mxu1 %v1077_v2  ;;  %v973_v20 = vld [vmem:[%s1200_s9] sm:$0xff]  }
  0x25   : > { %854 = vmatprep.subr.bf16.mxu0 %v1077_v2  ;;  %856 = vmatprep.mubr.msk.bf16.mxu0 %vm1078_vm1, %v1077_v2  ;;  %v615_v50 = vld [vmem:[%s1205_s15] sm:$0xf] }
  0x26   : > { %v620_v51 = vsel %vm567_vm4, %v615_v50, 0 }
  0x27   : > { %863 = vmatpush3.bf16.msra.mxu1 %v970_v4  ;;  %v613_v60 = vld [vmem:[#allocation2] sm:$0xff] }
  0x28   : > { %855 = vmatpush3.bf16.msra.mxu0 %v971_v5  ;;  %876 = vmatprep.subr.bf16.mxu1 %v1077_v2 }
  0x29   : > { %868 = vmatprep.subr.bf16.mxu0 %v1077_v2 }
  0x2a   : > { %865 = vmatmul.mubr.msk.bf16.vlgmr.msra.gmra.mxu1 %vm333_vm2, %v316_v6 }
  0x2b   : > { %857 = vmatmul.mubr.msk.bf16.vlgmr.msra.gmra.mxu0 %vm333_vm2, %v316_v6  ;;  %878 = vmatprep.mubr.msk.bf16.mxu1 %vm1078_vm1, %v1077_v2 }
  0x2c   : > { %872 = vmatprep.mubr.msk.bf16.mxu0 %vm1078_vm1, %v1077_v2  ;;  %869 = vmatpush3.bf16.msra.mxu0 %v972_v19 }
  0x2d   : > { %870 = vmatprep.subr.bf16.mxu0 %v1077_v2 }
  0x30   : > { %871 = vmatpush3.bf16.msra.mxu0 %v973_v20 }
  0x31   : > { %882 = vmatprep.subr.bf16.mxu0 %v1077_v2 }
  0x33   : > { %873 = vmatmul.mubr.msk.bf16.vlgmr.msra.gmra.mxu0 %vm333_vm2, %v316_v6 }
  0x34   : > { %884 = vmatprep.mubr.msk.bf16.mxu0 %vm1078_vm1, %v1077_v2 }
  0xea   : > { %v427_v7 = vpop.f32.mrf.mxu1 }
  0xeb   : > { %v371_v8 = vpop.f32.mrf.mxu0  ;;  %v497_v9 = vmul.f32 %v427_v7, %v427_v7 }
  0xec   : > { %v489_v10 = vmul.f32 %v371_v8, %v371_v8  ;;  %v866_v11 = vpop.f32.mrf.mxu1 }
  0xed   : > { %v858_v12 = vpop.f32.mrf.mxu0  ;;  %v498_v13 = vsel %vm490_vm3, %v497_v9, 0.0 }
  0xee   : > { %499 = vadd.xlane.f32.xlu0 %v498_v13  ;;  %v430_v14 = vpop.f32.mrf.mxu1  ;;  %v491_v16 = vsel %vm490_vm3, %v489_v10, 0.0 }
  0xef   : > { %v374_v15 = vpop.f32.mrf.mxu0 }
  0xf0   : > { %v867_v17 = vpop.f32.mrf.mxu1 }
  0xf1   : > { %v859_v18 = vpop.f32.mrf.mxu0 }
  0xf2   : > { %492 = vadd.xlane.f32.xlu0 %v491_v16 }
  0xf3   : > { %v483_v38 = vpop.f32.mrf.mxu0 }
  0xf4   : > { %v563_v39 = vpack.c.bf16 %v483_v38, %v483_v38 }
  0xf5   : > { %v874_v40 = vpop.f32.mrf.mxu0 }
  0xf6   : > { %v569_v41 = vsel %vm567_vm4, %v563_v39, 0 }
  0xf7   : > { %v486_v42 = vpop.f32.mrf.mxu0  ;;  %883 = vmatpush3.bf16.msra.mxu0 %v569_v41 }
  0xf9   : > { %v875_v43 = vpop.f32.mrf.mxu0 }
 0x177   : > { %v500_v21 = vpop.xlane.xlu0 %499 }
 0x178   : > { %v501_v22 = vadd.f32 1e-12, %v500_v21 }
 0x17a   : > { %974 = vrsqrt.f32 %v501_v22 }
 0x17b   : > { %v493_v23 = vpop.xlane.xlu0 %492 }
 0x17c   : > { %v494_v24 = vadd.f32 1e-12, %v493_v23 }
 0x17e   : > { %976 = vrsqrt.f32 %v494_v24 }
 0x187   : > { %v975_v25 = vpop.eup %974 }
 0x188   : > { %v503_v26 = vmul.f32 %v975_v25, %v427_v7 }
 0x18a   : > { %v506_v27 = vpack.c.bf16 %v503_v26, %v503_v26 }
 0x18b   : > { %v977_v28 = vpop.eup %976 }
 0x18c   : > { %v511_v29 = vsel %vm490_vm3, %v506_v27, 0  ;;  %v496_v30 = vmul.f32 %v977_v28, %v371_v8 }
 0x18d   : > { %877 = vmatpush3.bf16.xpose.msra.mxu1 %v511_v29 }
 0x18e   : > { %v504_v31 = vmul.f32 0.35355338, %v496_v30  ;;  %888 = vmatprep.subr.bf16.mxu1 %v1077_v2 }
 0x190   : > { %v505_v32 = vpack.c.bf16 %v504_v31, %v504_v31 }
 0x194   : > { %879 = vmatmul.mubr.msk.bf16.vlgmr.msra.gmra.mxu1 %vm490_vm3, %v505_v32 }
 0x195   : > { %890 = vmatprep.mubr.msk.bf16.mxu1 %vm1078_vm1, %v1077_v2  ;;  %889 = vmatpush3.bf16.msra.mxu1 %v620_v51 }
 0x254   : > { %v547_v33 = vpop.f32.mrf.mxu1 }
 0x255   : > { %v553_v34 = vsel %vm490_vm3, %v547_v33, -inf }
 0x256   : > { %554 = vmax.xlane.f32.xlu1 %v553_v34  ;;  %v880_v35 = vpop.f32.mrf.mxu1 }
 0x258   : > { %v550_v36 = vpop.f32.mrf.mxu1 }
 0x25a   : > { %v881_v37 = vpop.f32.mrf.mxu1 }
 0x2df   : > { %v555_v44 = vpop.xlane.xlu1 %554 }
 0x2e0   : > { %v556_v45 = vsub.f32 %v547_v33, %v555_v44 }
 0x2e2   : > { %v557_v46 = vmul.f32 1.442695, %v556_v45 }
 0x2e4   : > { %978 = vpow2.f32 %v557_v46 }
 0x2f1   : > { %v979_v47 = vpop.eup %978 }
 0x2f2   : > { %v559_v48 = vsel %vm490_vm3, %v979_v47, 0.0  ;;  %v562_v49 = vpack.c.bf16 %v979_v47, %v979_v47 }
 0x2f3   : > { %560 = vadd.xlane.f32.xlu1 %v559_v48 }
 0x2f4   : > { %885 = vmatmul.mubr.msk.bf16.vlgmr.msra.gmra.mxu0 %vm490_vm3, %v562_v49 }
 0x37c   : > { %v561_v52 = vpop.xlane.xlu1 %560 }
 0x37d   : > { %980 = vrcp.f32 %v561_v52 }
 0x38a   : > { %v981_v53 = vpop.eup %980 }
 0x3b4   : > { %v605_v54 = vpop.f32.mrf.mxu0 }
 0x3b5   : > { %v612_v55 = vmul.f32 %v981_v53, %v605_v54 }
 0x3b6   : > { %v886_v56 = vpop.f32.mrf.mxu0 }
 0x3b7   : > { %v614_v57 = vpack.c.bf16 %v612_v55, %v612_v55 }
 0x3b8   : > { %v608_v58 = vpop.f32.mrf.mxu0 }
 0x3b9   : > { %891 = vmatmul.mubr.msk.bf16.vlgmr.msra.gmra.mxu1 %vm490_vm3, %v614_v57 }
 0x3ba   : > { %v887_v59 = vpop.f32.mrf.mxu0 }
 0x479   : > { %v656_v61 = vpop.f32.mrf.mxu1 }
 0x47a   : > { %v662_v62 = vadd.f32 %v656_v61, %v613_v60 }
 0x47b   : > { %v892_v63 = vpop.f32.mrf.mxu1  ;;  %667 = sbr.rel (%p829_p1) target bundleno = 1157 (0x485), region = 48 }
 0x47c   : > { %663 = vst.msk [vmem:[#allocation2] sm:$0xff] %vm333_vm2, %v662_v62 }
 0x47d   : > { %v659_v0 = vpop.f32.mrf.mxu1 }
 0x47f   : > { %v893_v1 = vpop.f32.mrf.mxu1 }
 0x483   : > { %v668_v2 = vld [vmem:[#allocation2] sm:$0xff] }
 0x484   : > { %669 = vst.msk [vmem:[%s285_s14] sm:$0xff] %vm333_vm2, %v668_v2 }
 0x485 PF: > { %s831_s20 = sshll.u32 %s1062_s22, 7  ;;  %s684_s29 = sshll.u32 %s285_s14, 4  ;;  %s685_s29 = int_to_ptr.vmem [resolvable:$true] %s684_s29 }
 0x486   : > { %s682_s28 = scalar_lea.hbm %s1304_s5, %s831_s20  ;;  %s1320_s21 = sand.u32 1, %s1050_s19  }
 0x487   : > { %s671_s6 = scalar_lea.sflag [#allocation4], %s1320_s21  ;;  %s982_s9 = scalar_lea.vmem %s685_s29, 128 }
 0x488   : > { %p983_p2 = scmp.ne.s32.totalorder %s685_s29, %s982_s9  ;;  %s1079_s10 = smov [#allocation3]  }
 0x489   : > { %s986_s13 = sshll.u32 %s1079_s10, 4  ;;  %s987_s13 = int_to_ptr.vmem [resolvable:$false] %s986_s13 }
 0x48a   : > { %p984_p4 = pnand %p983_p2, %p1159_p3  ;;  %s988_s16 = scalar_lea.vmem %s987_s13, 256 }
 0x48b   : > { %p989_p6 = scmp.lt.s32.totalorder %s685_s29, %s987_s13  ;;  %p990_p7 = scmp.lt.s32.totalorder %s988_s16, %s982_s9 }
 0x48c   : > { %p985_p5 = pneg %p984_p4 }
 0x48d   : > { %p991_p8 = por %p990_p7, %p989_p6 }
 0x48f   : > { %p992_p10 = pnand %p991_p8, %p985_p5 }
 0x491   : > { %995 = shalt.err (!%p992_p10)
}
 0x492   : > { %s996_s22 = scalar_lea.hbm %s682_s28, 128  ;;  %s1000_s26 = scalar_lea.hbm %s1304_s5, 256 }
 0x493   : > { %p997_p11 = scmp.ne.s32.totalorder %s682_s28, %s996_s22  ;;  %p1001_p0 = scmp.lt.s32.totalorder %s682_s28, %s1304_s5 }
 0x494   : > { %p1002_p1 = scmp.lt.s32.totalorder %s1000_s26, %s996_s22 }
 0x495   : > { %p998_p12 = pnand %p997_p11, %p1159_p3 }
 0x496   : > { %p1003_p2 = por %p1002_p1, %p1001_p0 }
 0x497   : > { %p999_p13 = pneg %p998_p12 }
 0x499   : > { %p1004_p4 = pnand %p1003_p2, %p999_p13 }
 0x49b   : > { %1007 = shalt.err (!%p1004_p4)
}
 0x49c   : > { %894 = dma.vmem_to_hbm [thread:$0]  (%p1159_p3), %s685_s29, 128, %s682_s28, %s671_s6  }
 0x49d PF: > { %p900_p5 = scmp.ge.s32.totalorder %s1074_s25, 2  ;;  %s696_s12 = sand.u32 1, %s1046_s18  }
 0x49e   : > { %s697_s15 = scalar_lea.sflag [#allocation4], %s696_s12 }
 0x49f   : > { %p897_p6 = pnand %p900_p5, %p1169_p9 }
 0x4a1   : > { %p898_p7 = pneg %p897_p6 }
 0x4a3   : > { %1041 = dma.done.wait (%p898_p7), %s697_s15, 128  }
 0x4a4   : > { %1043 = vsyncadd (%p898_p7), %s697_s15, 4294967168  ;;  %s18_s25 = sadd.s32 1, %s1074_s25   ;;  %s1322_s14 = sld [smem:[#allocation6_spill]] }
 0x4a5   : > { %p15_p8 = scmp.ge.s32.totalorder %s18_s25, 10   ;;  %s1323_s20 = sld [smem:[#allocation12_spill]] }
 0x4a6   : > { %s1324_s21 = sld [smem:[#allocation7_spill]]  ;;  %s1328_s18 = smov %s1050_s19 }
 0x4a7   : > { %s1325_s22 = sld [smem:[#allocation8_spill]]  ;;  %17 = sbr.rel (!%p15_p8) target bundleno = 5 (0x5), region = 95 }
 0x4a8   : > { %s1326_s23 = sld [smem:[#allocation9_spill]] }
 0x4a9   : > { %s1327_s24 = sld [smem:[#allocation10_spill]] }
 0x4aa   : > { %s1329_s19 = smov %s1322_s14 }
 0x4ac   :  { %702 = vsyncpa [#allocation4], 1 }
 0x4ad   :  { %704 = vsyncpa [#allocation4 + $0x1], 1 }

</bundles_post_ra>
